<compile_context>
chip_gen: v5e
topology: v5e:2x2
jax: 0.10.0
libtpu: 0.0.40
codegen_flags: <defaults>
</compile_context>

<pallas_src>
import functools
import math

import jax
import jax.numpy as jnp
from jax.experimental import pallas as pl
from jax.experimental.pallas import tpu as pltpu


def _round_up(x, m):
    return ((x + m - 1) // m) * m


# ---------------------------------------------------------------------------
# Stage 1: L2-normalize rows, fold 1/sqrt(T), cast to matmul dtype, emit shift.
# ---------------------------------------------------------------------------
def _normalize_kernel(f_ref, fn_ref, shift_ref, *, inv_temp):
    f = f_ref[...]                                        # (tm, D_pad) f32
    sq = jnp.sum(f * f, axis=1, keepdims=True)            # (tm, 1)
    # 1 / max(||f||, 1e-12)  ==  rsqrt(max(||f||^2, 1e-24))   (F.normalize)
    inv = jax.lax.rsqrt(jnp.maximum(sq, 1e-24))
    # Fold 1/sqrt(T) into the shared operand: fn_i . fn_j == (f_i.f_j)/T.
    fn_ref[...] = (f * (inv * math.sqrt(inv_temp))).astype(fn_ref.dtype)
    # Per-row diagonal of the scaled similarity == ||f_i||^2/(||f_i||^2 T)
    # (== 1/T for valid rows, 0 for zero-norm rows).  Only used as a bounded
    # exp shift; it cancels exactly in the numer/denom ratio.
    shift_ref[...] = (sq * inv * inv) * inv_temp


# ---------------------------------------------------------------------------
# Stage 2: tiled similarity + masked exp-sums + per-row loss contribution.
# ---------------------------------------------------------------------------
def _supcon_tile_kernel(lhs_ref, rhs_ref, shift_ref, labc_ref, labr_ref,
                        perrow_ref, valid_ref,
                        numer_acc, denom_acc, *, n_valid, eps, has_pad):
    i = pl.program_id(0)
    j = pl.program_id(1)
    nj = pl.num_programs(1)
    tm = lhs_ref.shape[0]
    tn = rhs_ref.shape[0]

    @pl.when(j == 0)
    def _init():
        numer_acc[...] = jnp.zeros_like(numer_acc)
        denom_acc[...] = jnp.zeros_like(denom_acc)

    # (tm, tn) similarity tile: contract dim 1 of both operands (RHS is a
    # plain row-block of the normalized features — no transpose anywhere).
    sim = jax.lax.dot_general(
        lhs_ref[...], rhs_ref[...],
        dimension_numbers=(((1,), (1,)), ((), ())),
        preferred_element_type=jnp.float32)               # (tm, tn) f32
    z = jnp.exp(sim - shift_ref[...])                      # EUP, (tm, tn)
    eq = labc_ref[...] == labr_ref[...]                    # (tm,1)==(1,tn)

    def lane_fold(x):                                      # (tm, tn)->(tm,128)
        acc = x[:, 0:128]
        for c in range(128, tn, 128):
            acc = acc + x[:, c:c + 128]
        return acc

    row_start = i * tm
    col_start = j * tn
    # The diagonal of this row tile lives in exactly one column tile
    # (tn % tm == 0 by construction).
    is_diag = jnp.logical_and(row_start >= col_start, row_start < col_start + tn)
    special = jnp.logical_or(is_diag, j == nj - 1) if has_pad else is_diag

    @pl.when(jnp.logical_not(special))
    def _fast():
        # Steady state: no iotas, no padding/diagonal masks.
        numer_acc[...] += lane_fold(jnp.where(eq, z, 0.0))
        denom_acc[...] += lane_fold(z)

    @pl.when(special)
    def _masked():
        # Diagonal-containing tile and/or last (padded) column tile only.
        ri = jax.lax.broadcasted_iota(jnp.int32, (tm, tn), 0) + row_start
        ci = jax.lax.broadcasted_iota(jnp.int32, (tm, tn), 1) + col_start
        zc = jnp.where(ci < n_valid, z, 0.0)               # mask padded cols
        numer_acc[...] += lane_fold(jnp.where(eq & (ri != ci), zc, 0.0))
        denom_acc[...] += lane_fold(zc)

    @pl.when(j == nj - 1)
    def _finalize():
        numer = jnp.sum(numer_acc[...], axis=1, keepdims=True)   # (tm, 1)
        denom = jnp.sum(denom_acc[...], axis=1, keepdims=True)
        row_idx = jax.lax.broadcasted_iota(jnp.int32, (tm, 1), 0) + row_start
        # numer > 0  <=>  at least one same-label off-diagonal valid column.
        row_ok = (numer > 0.0) & (row_idx < n_valid)
        # -log((numer+eps)/(denom+eps)) == log(denom+eps) - log(numer+eps)
        per_row = jnp.log(denom + eps) - jnp.log(numer + eps)
        perrow_ref[...] = jnp.where(row_ok, per_row, 0.0)
        valid_ref[...] = jnp.where(row_ok, 1.0, 0.0)


# ---------------------------------------------------------------------------
# Wrapper
# ---------------------------------------------------------------------------
def supcon_loss(features, labels, temperature=0.07, eps=1e-8,
                matmul_dtype=jnp.bfloat16):
    """Pallas TPU implementation of SupConLoss.forward (PyTorch semantics)."""
    features = jnp.asarray(features, jnp.float32)
    labels = jnp.asarray(labels)
    if features.ndim == 3:
        B, V, D = features.shape
        # torch: features.view(B*views, D)  -> batch-major rows
        features = features.reshape(B * V, D)
        # torch: labels.repeat(views) on a 1-D tensor == tiling (NOT interleave)
        labels = jnp.tile(labels, V)
    N, D = features.shape
    labels = labels.astype(jnp.int32)

    # ---- padding / tile selection (tn % tm == 0, tn % 128 == 0 always) ----
    d_pad = _round_up(D, 128)
    n128 = _round_up(N, 128)
    small = (n128 <= 1024) and (n128 * d_pad * 2 <= (8 << 20))
    if small:
        # Single column tile (RHS fetched once / resident); >=2 row tiles
        # whenever N > 128 so both v7x TensorCores get work.
        n_pad = n128
        tm, tn = 128, n_pad
    else:
        tm, tn = 256, 512
        n_pad = _round_up(N, 512)
    has_pad = n_pad > N
    # TODO(synk): for very large D the (tm, D)/(tn, D) operand tiles should
    # additionally be tiled along the contraction dim (third grid axis).

    f_p = jnp.pad(features, ((0, n_pad - N), (0, d_pad - D)))
    lab_p = jnp.pad(labels, (0, n_pad - N))     # padded cols masked in-kernel
    lab_col = lab_p.reshape(n_pad, 1)
    lab_row = lab_p.reshape(1, n_pad)

    inv_temp = 1.0 / float(temperature)

    # ---- stage 1: normalize + fold 1/sqrt(T) + cast + per-row shift --------
    norm_kernel = functools.partial(_normalize_kernel, inv_temp=inv_temp)
    fn_s, shift = pl.pallas_call(
        norm_kernel,
        out_shape=(jax.ShapeDtypeStruct((n_pad, d_pad), matmul_dtype),
                   jax.ShapeDtypeStruct((n_pad, 1), jnp.float32)),
        grid_spec=pltpu.PrefetchScalarGridSpec(
            num_scalar_prefetch=0,
            grid=(n_pad // tm,),
            in_specs=[pl.BlockSpec((tm, d_pad), lambda i: (i, 0))],
            out_specs=[pl.BlockSpec((tm, d_pad), lambda i: (i, 0)),
                       pl.BlockSpec((tm, 1), lambda i: (i, 0))]),
        compiler_params=pltpu.CompilerParams(
            dimension_semantics=("parallel",)),
    )(f_p)

    # ---- stage 2: tiled similarity / masked exp-sums / per-row loss --------
    main_kernel = functools.partial(
        _supcon_tile_kernel, n_valid=N, eps=float(eps), has_pad=has_pad)
    per_row, valid = pl.pallas_call(
        main_kernel,
        out_shape=(jax.ShapeDtypeStruct((n_pad, 1), jnp.float32),
                   jax.ShapeDtypeStruct((n_pad, 1), jnp.float32)),
        grid_spec=pltpu.PrefetchScalarGridSpec(
            num_scalar_prefetch=0,
            grid=(n_pad // tm, n_pad // tn),
            in_specs=[
                pl.BlockSpec((tm, d_pad), lambda i, j: (i, 0)),   # LHS rows
                pl.BlockSpec((tn, d_pad), lambda i, j: (j, 0)),   # RHS rows
                pl.BlockSpec((tm, 1), lambda i, j: (i, 0)),       # shift
                pl.BlockSpec((tm, 1), lambda i, j: (i, 0)),       # labels (col)
                pl.BlockSpec((1, tn), lambda i, j: (0, j)),       # labels (row)
            ],
            out_specs=[pl.BlockSpec((tm, 1), lambda i, j: (i, 0)),
                       pl.BlockSpec((tm, 1), lambda i, j: (i, 0))],
            scratch_shapes=[pltpu.VMEM((tm, 128), jnp.float32),
                            pltpu.VMEM((tm, 128), jnp.float32)]),
        compiler_params=pltpu.CompilerParams(
            dimension_semantics=("parallel", "arbitrary"),
            vmem_limit_bytes=40 * 1024 * 1024),
    )(fn_s, fn_s, shift, lab_col, lab_row)

    # ---- tiny final mean over valid rows (O(N) jnp reduction) --------------
    loss_sum = jnp.sum(per_row)
    cnt = jnp.sum(valid)
    return jnp.where(cnt > 0.0, loss_sum / jnp.maximum(cnt, 1.0), 0.0)


def supcon_loss_ref(features, labels, temperature=0.07, eps=1e-8):
    """Pure-JAX reference mirroring the PyTorch module (sanity check only)."""
    features = jnp.asarray(features, jnp.float32)
    labels = jnp.asarray(labels)
    if features.ndim == 3:
        B, V, D = features.shape
        features = features.reshape(B * V, D)
        labels = jnp.tile(labels, V)
    nrm = jnp.maximum(jnp.linalg.norm(features, axis=1, keepdims=True), 1e-12)
    f = features / nrm
    sim = jnp.matmul(f, f.T, precision=jax.lax.Precision.HIGHEST) / temperature
    sim = sim - jnp.max(sim, axis=1, keepdims=True)
    mask = (labels[:, None] == labels[None, :]).astype(jnp.float32)
    mask = mask * (1.0 - jnp.eye(f.shape[0], dtype=jnp.float32))
    exp_sim = jnp.exp(sim)
    numer = jnp.sum(exp_sim * mask, axis=1)
    denom = jnp.sum(exp_sim, axis=1)
    pos = jnp.sum(mask, axis=1)
    valid = pos > 0
    per = -jnp.log((numer + eps) / (denom + eps))
    cnt = jnp.sum(valid.astype(jnp.float32))
    return jnp.where(cnt > 0, jnp.sum(jnp.where(valid, per, 0.0)) / cnt, 0.0)


if __name__ == "__main__":
    key = jax.random.PRNGKey(0)
    kf, kl, kf2, kl2 = jax.random.split(key, 4)

    # (a) 3-D input: batch=8, views=2, hidden=32 -> N=16 rows, D=32.
    B, V, D = 8, 2, 32
    features = jax.random.normal(kf, (B, V, D), dtype=jnp.float32)
    labels = jax.random.randint(kl, (B,), 0, 3, dtype=jnp.int32)
    ref = supcon_loss_ref(features, labels)

    loss_bf16 = supcon_loss(features, labels)                       # default bf16 MXU path
    jax.block_until_ready(loss_bf16)
    assert jnp.allclose(loss_bf16, ref, rtol=3e-2, atol=3e-2), (loss_bf16, ref)

    loss_f32 = supcon_loss(features, labels, matmul_dtype=jnp.float32)
    jax.block_until_ready(loss_f32)
    assert jnp.allclose(loss_f32, ref, rtol=3e-3, atol=3e-3), (loss_f32, ref)

    # (b) 2-D input with singleton labels (invalid rows) and row padding.
    f2 = jax.random.normal(kf2, (12, 40), dtype=jnp.float32)
    l2 = jnp.array([0, 0, 1, 1, 2, 2, 3, 3, 4, 4, 5, 6], dtype=jnp.int32)
    ref2 = supcon_loss_ref(f2, l2)
    out2 = supcon_loss(f2, l2)
    jax.block_until_ready(out2)
    assert jnp.allclose(out2, ref2, rtol=3e-2, atol=3e-2), (out2, ref2)

    # (c) large-N path: multiple row/column tiles, diagonal + padded-tile branches.
    kf3, kl3 = jax.random.split(kl2)
    f3 = jax.random.normal(kf3, (1100, 64), dtype=jnp.float32)
    l3 = jax.random.randint(kl3, (1100,), 0, 41, dtype=jnp.int32)
    ref3 = supcon_loss_ref(f3, l3)
    out3 = supcon_loss(f3, l3)
    jax.block_until_ready(out3)
    assert jnp.allclose(out3, ref3, rtol=3e-2, atol=3e-2), (out3, ref3)

    print("KERNEL_OK")
</pallas_src>

<mosaic_0001>
module attributes {stable_mosaic.version = 11 : i64} {
  func.func @_normalize_kernel(%arg0: i32, %arg1: memref<128x128xf32, #tpu.memory_space<vmem>>, %arg2: memref<128x128xbf16, #tpu.memory_space<vmem>>, %arg3: memref<128x1xf32, #tpu.memory_space<vmem>>) attributes {dimension_semantics = [#tpu.dimension_semantics<parallel>], iteration_bounds = array<i64: 1>, scalar_prefetch = 0 : i64, scratch_operands = 0 : i64, tpu.core_type = #tpu.core_type<tc>, window_params = [{transform_indices = @transform_0, window_bounds = array<i64: 128, 128>}, {transform_indices = @transform_1, window_bounds = array<i64: 128, 128>}, {transform_indices = @transform_2, window_bounds = array<i64: 128, 1>}]} {
    %c0 = arith.constant 0 : index
    %c0_0 = arith.constant 0 : index
    %0 = vector.load %arg1[%c0, %c0_0] : memref<128x128xf32, #tpu.memory_space<vmem>>, vector<128x128xf32>
    %1 = arith.mulf %0, %0 : vector<128x128xf32>
    %cst = arith.constant dense<0.000000e+00> : vector<128xf32>
    %2 = vector.multi_reduction <add>, %1, %cst [1] : vector<128x128xf32> to vector<128xf32>
    %3 = vector.shape_cast %2 : vector<128xf32> to vector<128x1xf32>
    %cst_1 = arith.constant 1.000000e-24 : f32
    %4 = vector.broadcast %cst_1 : f32 to vector<128x1xf32>
    %5 = arith.maximumf %3, %4 : vector<128x1xf32>
    %6 = math.rsqrt %5 : vector<128x1xf32>
    %cst_2 = arith.constant 3.77964473 : f32
    %7 = vector.broadcast %cst_2 : f32 to vector<128x1xf32>
    %8 = arith.mulf %6, %7 : vector<128x1xf32>
    %9 = vector.broadcast %8 : vector<128x1xf32> to vector<128x128xf32>
    %10 = arith.mulf %0, %9 : vector<128x128xf32>
    %11 = arith.truncf %10 : vector<128x128xf32> to vector<128x128xbf16>
    %c0_3 = arith.constant 0 : index
    %c0_4 = arith.constant 0 : index
    %12 = vector.load %arg2[%c0_3, %c0_4] : memref<128x128xbf16, #tpu.memory_space<vmem>>, vector<128x128xbf16>
    tpu.vector_store %arg2[%c0_3, %c0_4], %11 {strides = array<i32>} : memref<128x128xbf16, #tpu.memory_space<vmem>>, vector<128x128xbf16>,
    %13 = arith.mulf %3, %6 : vector<128x1xf32>
    %14 = arith.mulf %13, %6 : vector<128x1xf32>
    %cst_5 = arith.constant 14.2857141 : f32
    %15 = vector.broadcast %cst_5 : f32 to vector<128x1xf32>
    %16 = arith.mulf %14, %15 : vector<128x1xf32>
    %c0_6 = arith.constant 0 : index
    %c0_7 = arith.constant 0 : index
    %17 = vector.load %arg3[%c0_6, %c0_7] : memref<128x1xf32, #tpu.memory_space<vmem>>, vector<128x1xf32>
    tpu.vector_store %arg3[%c0_6, %c0_7], %16 {strides = array<i32>} : memref<128x1xf32, #tpu.memory_space<vmem>>, vector<128x1xf32>,
    return
  }
  func.func @transform_0(%arg0: i32) -> (i32, i32) {
    %c0_i32 = arith.constant 0 : i32
    %c0_i32_0 = arith.constant 0 : i32
    return %arg0, %c0_i32 : i32, i32
  }
  func.func @transform_1(%arg0: i32) -> (i32, i32) {
    %c0_i32 = arith.constant 0 : i32
    %c0_i32_0 = arith.constant 0 : i32
    return %arg0, %c0_i32 : i32, i32
  }
  func.func @transform_2(%arg0: i32) -> (i32, i32) {
    %c0_i32 = arith.constant 0 : i32
    %c0_i32_0 = arith.constant 0 : i32
    return %arg0, %c0_i32 : i32, i32
  }
}

</mosaic_0001>

<bundles_post_ra>
// kernel: tpu_custom_call.1
= control target key start
LH: loop header
LB: loop body
LE: loop exit
PB: predicated region body
PF: predicated region fallthrough
CT: control target
= control target key end

     0   :  { %8 = vsyncpa [#allocation3], 0  ;;  %s970_s0 = inlined_call_operand.hbm [shape: f32[128,128], index: 0, kind: input, shape index: {}]   ;;  %s971_s1 = inlined_call_operand.hbm [shape: bf16[128,128], index: 1, kind: output, shape index: {0}]   ;;  %s972_s2 = inlined_call_operand.vmem [shape: f32[128,1], index: 2, kind: output, shape index: {1}]  }
   0x1   :  { %9 = vsyncpa [#allocation4], 0  ;;  %s14_s11 = sshll.u32 %s970_s0, 4  ;;  %s556_s12 = smov [#allocation2]   ;;  %s15_s11 = int_to_ptr.hbm [resolvable:$true] %s14_s11 }
   0x2   :  { %s16_s13 = sshll.u32 %s556_s12, 4  ;;  %s557_s14 = smov 128   ;;  %s17_s13 = int_to_ptr.vmem [resolvable:$true] %s16_s13 }
   0x3   :  { %s558_s15 = smov 8  }
   0x4   :  { %22 = dma.hbm_to_vmem [thread:$0]  %s15_s11, 2048, %s17_s13, [#allocation3], %s557_s14, %s557_s14, %s558_s15  }
   0x5   :  { %552 = dma.done.wait [#allocation3], 2048  }
   0x6   :  { %553 = vsyncadd [#allocation3], 4294965248  ;;  %v580_v0 = vld [vmem:[#allocation2 + $0x20] sm:$0xff]  ;;  %v582_v1 = vld [vmem:[#allocation2 + $0x10] sm:$0xff]  ;;  %vm379_vm1 = vcmask 7168   ;;  %s559_s16 = smov [#allocation5]  }
   0x7   :  { %v584_v2 = vld [vmem:[#allocation2] sm:$0xff]  ;;  %v47_v3 = vmul.f32 %v580_v0, %v580_v0  ;;  %v45_v4 = vmul.f32 %v582_v1, %v582_v1  ;;  %v592_v6 = vld [vmem:[#allocation2 + $0x28] sm:$0xff]  ;;  %v594_v7 = vld [vmem:[#allocation2 + $0x18] sm:$0xff]  ;;  %s400_s17 = sshll.u32 %s559_s16, 4  ;;  %s402_s20 = sshll.u32 %s971_s1, 4  ;;  %s401_s17 = int_to_ptr.vmem [resolvable:$true] %s400_s17  ;;  %s403_s20 = int_to_ptr.hbm [resolvable:$true] %s402_s20 }
   0x8   :  { %v43_v5 = vmul.f32 %v584_v2, %v584_v2  ;;  %v596_v8 = vld [vmem:[#allocation2 + $0x8] sm:$0xff]  ;;  %v48_v9 = vmul.f32 %v592_v6, %v592_v6  ;;  %v46_v10 = vmul.f32 %v594_v7, %v594_v7  ;;  %v604_v12 = vld [vmem:[#allocation2 + $0x40] sm:$0xff]  ;;  %v606_v13 = vld [vmem:[#allocation2 + $0x38] sm:$0xff]  ;;  %s560_s23 = smov 64   ;;  %s561_s24 = smov 4  }
   0x9   :  { %67 = vadd.xlane.f32.xlu2 %v47_v3  ;;  %63 = vadd.xlane.f32.xlu1 %v45_v4  ;;  %v44_v11 = vmul.f32 %v596_v8, %v596_v8  ;;  %v608_v14 = vld [vmem:[#allocation2 + $0x30] sm:$0xff]  ;;  %v51_v15 = vmul.f32 %v604_v12, %v604_v12  ;;  %v50_v16 = vmul.f32 %v606_v13, %v606_v13  ;;  %v616_v18 = vld [vmem:[#allocation2 + $0x58] sm:$0xff]  ;;  %v620_v20 = vld [vmem:[#allocation2 + $0x48] sm:$0xff] }
   0xa   :  { %59 = vadd.xlane.f32.xlu0 %v43_v5  ;;  %v49_v17 = vmul.f32 %v608_v14, %v608_v14  ;;  %v618_v19 = vld [vmem:[#allocation2 + $0x50] sm:$0xff]  ;;  %v54_v21 = vmul.f32 %v616_v18, %v616_v18  ;;  %v52_v23 = vmul.f32 %v620_v20, %v620_v20  ;;  %v630_v25 = vld [vmem:[#allocation2 + $0x68] sm:$0xff]  ;;  %v632_v26 = vld [vmem:[#allocation2 + $0x60] sm:$0xff] }
   0xb   :  { %v53_v22 = vmul.f32 %v618_v19, %v618_v19  ;;  %v628_v24 = vld [vmem:[#allocation2 + $0x70] sm:$0xff]  ;;  %v56_v28 = vmul.f32 %v630_v25, %v630_v25  ;;  %v55_v29 = vmul.f32 %v632_v26, %v632_v26  ;;  %v640_v30 = vld [vmem:[#allocation2 + $0x78] sm:$0xff] }
   0xc   :  { %v57_v27 = vmul.f32 %v628_v24, %v628_v24  ;;  %v58_v31 = vmul.f32 %v640_v30, %v640_v30 }
  0x11   :  { %69 = vadd.xlane.f32.xlu2 %v48_v9  ;;  %65 = vadd.xlane.f32.xlu1 %v46_v10 }
  0x12   :  { %61 = vadd.xlane.f32.xlu0 %v44_v11 }
  0x19   :  { %75 = vadd.xlane.f32.xlu2 %v51_v15  ;;  %73 = vadd.xlane.f32.xlu1 %v50_v16 }
  0x1a   :  { %71 = vadd.xlane.f32.xlu0 %v49_v17 }
  0x21   :  { %81 = vadd.xlane.f32.xlu2 %v54_v21  ;;  %79 = vadd.xlane.f32.xlu1 %v53_v22 }
  0x22   :  { %77 = vadd.xlane.f32.xlu0 %v52_v23 }
  0x29   :  { %87 = vadd.xlane.f32.xlu2 %v57_v27  ;;  %85 = vadd.xlane.f32.xlu1 %v56_v28 }
  0x2a   :  { %83 = vadd.xlane.f32.xlu0 %v55_v29 }
  0x32   :  { %89 = vadd.xlane.f32.xlu0 %v58_v31 }
  0x7c   :  { %v68_v32 = vpop.xlane.xlu2 %67  ;;  %v644_v33 = vpop.xlane.xlu1 %63 }
  0x7d   :  { %v95_v34 = vmax.f32 %v68_v32, 1e-24  ;;  %v93_v35 = vmax.f32 %v644_v33, 1e-24  ;;  %v647_v36 = vpop.xlane.xlu0 %59 }
  0x7e   :  { %v91_v37 = vmax.f32 %v647_v36, 1e-24 }
  0x7f   :  { %472 = vrsqrt.f32 %v95_v34  ;;  %vm153_vm0 = vweird.f32 %v95_v34  ;;  %vm133_vm3 = vweird.f32 %v93_v35 }
  0x80   :  { %474 = vrsqrt.f32 %v93_v35  ;;  %vm113_vm5 = vweird.f32 %v91_v37 }
  0x81   :  { %476 = vrsqrt.f32 %v91_v37 }
  0x84   :  { %v650_v38 = vpop.xlane.xlu2 %69  ;;  %v652_v39 = vpop.xlane.xlu1 %65 }
  0x85   :  { %v473_v40 = vpop.eup %472  ;;  %v655_v41 = vmax.f32 %v650_v38, 1e-24  ;;  %v658_v42 = vmax.f32 %v652_v39, 1e-24  ;;  %v660_v43 = vpop.xlane.xlu0 %61 }
  0x86   :  { %v475_v44 = vpop.eup %474  ;;  %v148_v45 = vmul.f32 %v473_v40, %v95_v34  ;;  %v663_v46 = vmax.f32 %v660_v43, 1e-24  ;;  %vm154_vm2 = vweird.f32 %v473_v40 }
  0x87   :  { %v477_v47 = vpop.eup %476  ;;  %v128_v48 = vmul.f32 %v475_v44, %v93_v35  ;;  %478 = vrsqrt.f32 %v655_v41  ;;  %vm134_vm4 = vweird.f32 %v475_v44  ;;  %vm155_vm7 = vmor %vm153_vm0, %vm154_vm2  ;;  %vm163_vm8 = vweird.f32 %v655_v41 }
  0x88   :  { %v149_v49 = vmul.f32 %v473_v40, %v148_v45  ;;  %v108_v50 = vmul.f32 %v477_v47, %v91_v37  ;;  %480 = vrsqrt.f32 %v658_v42  ;;  %vm114_vm6 = vweird.f32 %v477_v47  ;;  %vm135_vm9 = vmor %vm133_vm3, %vm134_vm4 }
  0x89   :  { %v129_v51 = vmul.f32 %v475_v44, %v128_v48  ;;  %482 = vrsqrt.f32 %v663_v46  ;;  %vm143_vm10 = vweird.f32 %v658_v42  ;;  %vm115_vm11 = vmor %vm113_vm5, %vm114_vm6  ;;  %vm123_vm13 = vweird.f32 %v663_v46 }
  0x8a   :  { %v150_v52 = vmul.f32 0.5, %v149_v49  ;;  %v109_v53 = vmul.f32 %v477_v47, %v108_v50 }
  0x8b   :  { %v130_v54 = vmul.f32 0.5, %v129_v51 }
  0x8c   :  { %v151_v55 = vsub.f32 1.5, %v150_v52  ;;  %v110_v56 = vmul.f32 0.5, %v109_v53  ;;  %v668_v57 = vpop.xlane.xlu2 %75  ;;  %v689_v17 = vpop.xlane.xlu1 %73 }
  0x8d   :  { %v479_v58 = vpop.eup %478  ;;  %v131_v59 = vsub.f32 1.5, %v130_v54  ;;  %v671_v60 = vmax.f32 %v668_v57, 1e-24  ;;  %v673_v61 = vpop.xlane.xlu0 %71 }
  0x8e   :  { %v675_v62 = vpop.eup %480  ;;  %v152_v63 = vmul.f32 %v473_v40, %v151_v55  ;;  %v111_v3 = vsub.f32 1.5, %v110_v56  ;;  %v158_v4 = vmul.f32 %v479_v58, %v655_v41  ;;  %vm164_vm12 = vweird.f32 %v479_v58 }
  0x8f   :  { %v678_v5 = vpop.eup %482  ;;  %v132_v9 = vmul.f32 %v475_v44, %v131_v59  ;;  %v138_v10 = vmul.f32 %v675_v62, %v658_v42  ;;  %484 = vrsqrt.f32 %v671_v60  ;;  %vm144_vm14 = vweird.f32 %v675_v62  ;;  %vm165_vm15 = vmor %vm163_vm8, %vm164_vm12 }
  0x90   :  { %v156_v11 = vsel %vm155_vm7, %v473_v40, %v152_v63  ;;  %v112_v15 = vmul.f32 %v477_v47, %v111_v3  ;;  %v159_v16 = vmul.f32 %v479_v58, %v158_v4  ;;  %v118_v27 = vmul.f32 %v678_v5, %v663_v46  ;;  %vm145_vm0 = vmor %vm143_vm10, %vm144_vm14 }
  0x91   :  { %v335_v21 = vmul.f32 %v156_v11, %v68_v32  ;;  %v136_v22 = vsel %vm135_vm9, %v475_v44, %v132_v9  ;;  %v139_v23 = vmul.f32 %v675_v62, %v138_v10  ;;  %v271_v28 = vmul.f32 3.7796447, %v156_v11 }
  0x92   :  { %v333_v29 = vmul.f32 %v136_v22, %v644_v33  ;;  %v116_v31 = vsel %vm115_vm11, %v477_v47, %v112_v15  ;;  %v160_v34 = vmul.f32 0.5, %v159_v16  ;;  %v699_v32 = vmax.f32 %v689_v17, 1e-24 }
  0x93   :  { %v351_v35 = vmul.f32 %v335_v21, %v156_v11  ;;  %v331_v40 = vmul.f32 %v116_v31, %v647_v36  ;;  %v269_v44 = vmul.f32 3.7796447, %v136_v22  ;;  %v140_v48 = vmul.f32 0.5, %v139_v23 }
  0x94   :  { %v349_v37 = vmul.f32 %v333_v29, %v136_v22  ;;  %v161_v45 = vsub.f32 1.5, %v160_v34  ;;  %v119_v33 = vmul.f32 %v678_v5, %v118_v27  ;;  %v706_v47 = vpop.xlane.xlu2 %81  ;;  %v287_v52 = vmul.f32 %v271_v28, %v580_v0  ;;  %v745_v21 = vpop.xlane.xlu1 %79 }
  0x95   :  { %v702_v49 = vpop.eup %484  ;;  %v367_v50 = vmul.f32 14.285714, %v351_v35  ;;  %v347_v51 = vmul.f32 %v331_v40, %v116_v31  ;;  %v708_v36 = vpop.xlane.xlu0 %77  ;;  %v141_v55 = vsub.f32 1.5, %v140_v48  ;;  %v267_v56 = vmul.f32 3.7796447, %v116_v31 }
  0x96   :  { %v365_v53 = vmul.f32 14.285714, %v349_v37  ;;  %v162_v54 = vmul.f32 %v479_v58, %v161_v45  ;;  %v120_v63 = vmul.f32 0.5, %v119_v33  ;;  %v188_v3 = vmul.f32 %v702_v49, %v671_v60 }
  0x97   :  { %384 = vst.msk [vmem:[%s972_s2 + $0x20] sm:$0xff] %vm379_vm1, %v367_v50  ;;  %v363_v59 = vmul.f32 14.285714, %v347_v51  ;;  %v285_v0 = vmul.f32 %v269_v44, %v582_v1  ;;  %v142_v9 = vmul.f32 %v675_v62, %v141_v55  ;;  %486 = vrsqrt.f32 %v699_v32 }
  0x98   :  { %382 = vst.msk [vmem:[%s972_s2 + $0x10] sm:$0xff] %vm379_vm1, %v365_v53  ;;  %v166_v4 = vsel %vm165_vm15, %v479_v58, %v162_v54  ;;  %v121_v1 = vsub.f32 1.5, %v120_v63  ;;  %v189_v58 = vmul.f32 %v702_v49, %v188_v3  ;;  %vm124_vm2 = vweird.f32 %v678_v5 }
  0x99   :  { %380 = vst.msk [vmem:[%s972_s2] sm:$0xff] %vm379_vm1, %v363_v59  ;;  %v272_v41 = vmul.f32 3.7796447, %v166_v4  ;;  %v336_v10 = vmul.f32 %v166_v4, %v650_v38  ;;  %v146_v11 = vsel %vm145_vm0, %v675_v62, %v142_v9  ;;  %v740_v15 = vmax.f32 %v673_v61, 1e-24  ;;  %vm125_vm4 = vmor %vm123_vm13, %vm124_vm2 }
  0x9a   :  { %v743_v16 = vmax.f32 %v706_v47, 1e-24  ;;  %v270_v42 = vmul.f32 3.7796447, %v146_v11  ;;  %v334_v23 = vmul.f32 %v146_v11, %v652_v39  ;;  %v122_v27 = vmul.f32 %v678_v5, %v121_v1 }
  0x9b   :  { %v288_v38 = vmul.f32 %v272_v41, %v592_v6  ;;  %v352_v22 = vmul.f32 %v336_v10, %v166_v4  ;;  %v190_v28 = vmul.f32 0.5, %v189_v58  ;;  %vm193_vm3 = vweird.f32 %v671_v60 }
  0x9c   :  { %488 = vrsqrt.f32 %v740_v15  ;;  %v286_v31 = vmul.f32 %v270_v42, %v594_v7  ;;  %v350_v34 = vmul.f32 %v334_v23, %v146_v11  ;;  %v126_v39 = vsel %vm125_vm4, %v678_v5, %v122_v27  ;;  %v763_v45 = vpop.xlane.xlu2 %87 }
  0x9d   :  { %v432_v62 = vpack.c.bf16 %v288_v38, %v287_v52  ;;  %v368_v29 = vmul.f32 14.285714, %v352_v22  ;;  %v757_v6 = vpop.eup %486  ;;  %v191_v35 = vsub.f32 1.5, %v190_v28  ;;  %vm194_vm5 = vweird.f32 %v702_v49  ;;  %v765_v48 = vpop.xlane.xlu0 %83 }
  0x9e   :  { %490 = vrsqrt.f32 %v743_v16  ;;  %v427_v40 = vpack.c.bf16 %v286_v31, %v285_v0  ;;  %v366_v44 = vmul.f32 14.285714, %v350_v34  ;;  %v268_v37 = vmul.f32 3.7796447, %v126_v39  ;;  %vm195_vm6 = vmor %vm193_vm3, %vm194_vm5 }
  0x9f   :  { %460 = vst [vmem:[#allocation5 + $0x10] sm:$0xff] %v432_v62   ;;  %v332_v7 = vmul.f32 %v126_v39, %v660_v43  ;;  %v192_v46 = vmul.f32 %v702_v49, %v191_v35  ;;  %v178_v5 = vmul.f32 %v757_v6, %v699_v32  ;;  %v775_v50 = vmax.f32 %v745_v21, 1e-24 }
  0xa0   :  { %385 = vst.msk [vmem:[%s972_s2 + $0x28] sm:$0xff] %vm379_vm1, %v368_v29  ;;  %v283_v51 = vmul.f32 %v267_v56, %v584_v2  ;;  %v284_v43 = vmul.f32 %v268_v37, %v596_v8  ;;  %v784_v52 = vmax.f32 %v708_v36, 1e-24  ;;  %v796_v54 = vmax.f32 %v763_v45, 1e-24 }
  0xa1   :  { %459 = vst [vmem:[#allocation5 + $0x8] sm:$0xff] %v427_v40   ;;  %v348_v33 = vmul.f32 %v332_v7, %v126_v39  ;;  %v196_v2 = vsel %vm195_vm6, %v702_v49, %v192_v46  ;;  %v179_v8 = vmul.f32 %v757_v6, %v178_v5  ;;  %492 = vrsqrt.f32 %v775_v50  ;;  %v805_v49 = vpop.xlane.xlu1 %85 }
  0xa2   :  { %v786_v53 = vpop.eup %488  ;;  %383 = vst.msk [vmem:[%s972_s2 + $0x18] sm:$0xff] %vm379_vm1, %v366_v44  ;;  %v422_v60 = vpack.c.bf16 %v284_v43, %v283_v51  ;;  %v339_v56 = vmul.f32 %v196_v2, %v668_v57  ;;  %vm183_vm7 = vweird.f32 %v699_v32  ;;  %494 = vrsqrt.f32 %v784_v52 }
  0xa3   :  { %v364_v55 = vmul.f32 14.285714, %v348_v33  ;;  %v180_v63 = vmul.f32 0.5, %v179_v8  ;;  %v168_v3 = vmul.f32 %v786_v53, %v740_v15  ;;  %vm184_vm8 = vweird.f32 %v757_v6 }
  0xa4   :  { %v799_v59 = vpop.eup %490  ;;  %423 = vst [vmem:[#allocation5] sm:$0xff] %v422_v60   ;;  %v355_v0 = vmul.f32 %v339_v56, %v196_v2  ;;  %vm173_vm9 = vweird.f32 %v740_v15  ;;  %v275_v4 = vmul.f32 3.7796447, %v196_v2  ;;  %496 = vrsqrt.f32 %v796_v54  ;;  %vm185_vm13 = vmor %vm183_vm7, %vm184_vm8 }
  0xa5   :  { %v218_v57 = vmul.f32 %v799_v59, %v743_v16  ;;  %381 = vst.msk [vmem:[%s972_s2 + $0x8] sm:$0xff] %vm379_vm1, %v364_v55  ;;  %v181_v9 = vsub.f32 1.5, %v180_v63  ;;  %v169_v41 = vmul.f32 %v786_v53, %v168_v3  ;;  %vm223_vm10 = vweird.f32 %v743_v16  ;;  %v841_v28 = vpop.xlane.xlu0 %89 }
  0xa6   :  { %v371_v10 = vmul.f32 14.285714, %v355_v0  ;;  %v820_v58 = vmax.f32 %v805_v49, 1e-24  ;;  %vm174_vm11 = vweird.f32 %v786_v53  ;;  %vm213_vm12 = vweird.f32 %v775_v50 }
  0xa7   :  { %v219_v1 = vmul.f32 %v799_v59, %v218_v57  ;;  %v822_v11 = vpop.eup %492  ;;  %v182_v38 = vmul.f32 %v757_v6, %v181_v9  ;;  %v170_v22 = vmul.f32 0.5, %v169_v41  ;;  %v839_v27 = vmax.f32 %v765_v48, 1e-24  ;;  %vm175_vm2 = vmor %vm173_vm9, %vm174_vm11 }
  0xa8   :  { %388 = vst.msk [vmem:[%s972_s2 + $0x40] sm:$0xff] %vm379_vm1, %v371_v10  ;;  %v208_v23 = vmul.f32 %v822_v11, %v775_v50  ;;  %498 = vrsqrt.f32 %v820_v58  ;;  %v843_v62 = vpop.eup %494  ;;  %v846_v29 = vmul.f32 %v275_v4, %v604_v12  ;;  %vm224_vm14 = vweird.f32 %v799_v59 }
  0xa9   :  { %v220_v42 = vmul.f32 0.5, %v219_v1  ;;  %v186_v31 = vsel %vm185_vm13, %v757_v6, %v182_v38  ;;  %v171_v32 = vsub.f32 1.5, %v170_v22  ;;  %vm214_vm15 = vweird.f32 %v822_v11  ;;  %vm225_vm3 = vmor %vm223_vm10, %vm224_vm14 }
  0xaa   :  { %v274_v34 = vmul.f32 3.7796447, %v186_v31  ;;  %v338_v39 = vmul.f32 %v186_v31, %v689_v17  ;;  %v209_v40 = vmul.f32 %v822_v11, %v208_v23  ;;  %v852_v44 = vpop.eup %496  ;;  %v198_v12 = vmul.f32 %v843_v62, %v784_v52  ;;  %vm215_vm7 = vmor %vm213_vm12, %vm214_vm15 }
  0xab   :  { %v221_v35 = vsub.f32 1.5, %v220_v42  ;;  %v172_v37 = vmul.f32 %v786_v53, %v171_v32  ;;  %vm203_vm0 = vweird.f32 %v784_v52  ;;  %v860_v6 = vmax.f32 %v841_v28, 1e-24 }
  0xac   :  { %v354_v7 = vmul.f32 %v338_v39, %v186_v31  ;;  %v210_v46 = vmul.f32 0.5, %v209_v40  ;;  %500 = vrsqrt.f32 %v839_v27  ;;  %v290_v5 = vmul.f32 %v274_v34, %v606_v13 }
  0xad   :  { %v222_v17 = vmul.f32 %v799_v59, %v221_v35  ;;  %v176_v51 = vsel %vm175_vm2, %v786_v53, %v172_v37  ;;  %v199_v43 = vmul.f32 %v843_v62, %v198_v12  ;;  %v248_v15 = vmul.f32 %v852_v44, %v796_v54 }
  0xae   :  { %vm253_vm4 = vweird.f32 %v796_v54  ;;  %v878_v33 = vpop.eup %498  ;;  %v370_v2 = vmul.f32 14.285714, %v354_v7  ;;  %v273_v8 = vmul.f32 3.7796447, %v176_v51  ;;  %v337_v13 = vmul.f32 %v176_v51, %v673_v61 }
  0xaf   :  { %v226_v53 = vsel %vm225_vm3, %v799_v59, %v222_v17  ;;  %v211_v16 = vsub.f32 1.5, %v210_v46  ;;  %v200_v56 = vmul.f32 0.5, %v199_v43  ;;  %vm243_vm5 = vweird.f32 %v820_v58 }
  0xb0   :  { %v278_v60 = vmul.f32 3.7796447, %v226_v53  ;;  %v342_v55 = vmul.f32 %v226_v53, %v706_v47  ;;  %387 = vst.msk [vmem:[%s972_s2 + $0x38] sm:$0xff] %vm379_vm1, %v370_v2  ;;  %v289_v63 = vmul.f32 %v273_v8, %v608_v14  ;;  %v353_v3 = vmul.f32 %v337_v13, %v176_v51 }
  0xb1   :  { %v249_v0 = vmul.f32 %v852_v44, %v248_v15  ;;  %v238_v61 = vmul.f32 %v878_v33, %v820_v58  ;;  %v212_v47 = vmul.f32 %v822_v11, %v211_v16  ;;  %v201_v57 = vsub.f32 1.5, %v200_v56 }
  0xb2   :  { %v358_v59 = vmul.f32 %v342_v55, %v226_v53  ;;  %vm204_vm6 = vweird.f32 %v843_v62  ;;  %v501_v4 = vpop.eup %500  ;;  %v437_v9 = vpack.c.bf16 %v290_v5, %v289_v63  ;;  %v369_v41 = vmul.f32 14.285714, %v353_v3 }
  0xb3   :  { %v250_v14 = vmul.f32 0.5, %v249_v0  ;;  %v239_v10 = vmul.f32 %v878_v33, %v238_v61  ;;  %v294_v1 = vmul.f32 %v278_v60, %v616_v18  ;;  %v216_v22 = vsel %vm215_vm7, %v822_v11, %v212_v47  ;;  %vm205_vm8 = vmor %vm203_vm0, %vm204_vm6 }
  0xb4   :  { %v374_v38 = vmul.f32 14.285714, %v358_v59  ;;  %v202_v42 = vmul.f32 %v843_v62, %v201_v57  ;;  %461 = vst [vmem:[#allocation5 + $0x18] sm:$0xff] %v437_v9   ;;  %v277_v23 = vmul.f32 3.7796447, %v216_v22  ;;  %v341_v31 = vmul.f32 %v216_v22, %v745_v21 }
  0xb5   :  { %v251_v32 = vsub.f32 1.5, %v250_v14  ;;  %v240_v50 = vmul.f32 0.5, %v239_v10  ;;  %386 = vst.msk [vmem:[%s972_s2 + $0x30] sm:$0xff] %vm379_vm1, %v369_v41  ;;  %vm254_vm9 = vweird.f32 %v852_v44  ;;  %v228_v11 = vmul.f32 %v501_v4, %v839_v27 }
  0xb6   :  { %v206_v18 = vsel %vm205_vm8, %v843_v62, %v202_v42  ;;  %502 = vrsqrt.f32 %v860_v6  ;;  %391 = vst.msk [vmem:[%s972_s2 + $0x58] sm:$0xff] %vm379_vm1, %v374_v38  ;;  %v293_v21 = vmul.f32 %v277_v23, %v618_v19  ;;  %v357_v52 = vmul.f32 %v341_v31, %v216_v22  ;;  %vm255_vm11 = vmor %vm253_vm4, %vm254_vm9 }
  0xb7   :  { %v276_v34 = vmul.f32 3.7796447, %v206_v18  ;;  %v340_v39 = vmul.f32 %v206_v18, %v708_v36  ;;  %v252_v35 = vmul.f32 %v852_v44, %v251_v32  ;;  %v241_v62 = vsub.f32 1.5, %v240_v50 }
  0xb8   :  { %vm244_vm10 = vweird.f32 %v878_v33  ;;  %v229_v40 = vmul.f32 %v501_v4, %v228_v11  ;;  %v447_v37 = vpack.c.bf16 %v294_v1, %v293_v21  ;;  %v373_v12 = vmul.f32 14.285714, %v357_v52 }
  0xb9   :  { %v292_v7 = vmul.f32 %v276_v34, %v620_v20  ;;  %v356_v17 = vmul.f32 %v340_v39, %v206_v18  ;;  %v256_v19 = vsel %vm255_vm11, %v852_v44, %v252_v35  ;;  %v242_v36 = vmul.f32 %v878_v33, %v241_v62  ;;  %vm245_vm12 = vmor %vm243_vm5, %vm244_vm10 }
  0xba   :  { %v230_v46 = vmul.f32 0.5, %v229_v40  ;;  %463 = vst [vmem:[#allocation5 + $0x28] sm:$0xff] %v447_v37   ;;  %v345_v43 = vmul.f32 %v256_v19, %v763_v45  ;;  %vm234_vm13 = vweird.f32 %v501_v4  ;;  %vm233_vm14 = vweird.f32 %v839_v27 }
  0xbb   :  { %v442_v5 = vpack.c.bf16 %v292_v7, %v846_v29  ;;  %v372_v51 = vmul.f32 14.285714, %v356_v17  ;;  %390 = vst.msk [vmem:[%s972_s2 + $0x50] sm:$0xff] %vm379_vm1, %v373_v12  ;;  %v246_v54 = vsel %vm245_vm12, %v878_v33, %v242_v36  ;;  %vm235_vm15 = vmor %vm233_vm14, %vm234_vm13  ;;  %vm263_vm2 = vweird.f32 %v860_v6 }
  0xbc   :  { %v503_v20 = vpop.eup %502  ;;  %v231_v44 = vsub.f32 1.5, %v230_v46  ;;  %v361_v15 = vmul.f32 %v345_v43, %v256_v19  ;;  %v280_v2 = vmul.f32 3.7796447, %v246_v54  ;;  %v344_v29 = vmul.f32 %v246_v54, %v805_v49 }
  0xbd   :  { %462 = vst [vmem:[#allocation5 + $0x20] sm:$0xff] %v442_v5   ;;  %v258_v58 = vmul.f32 %v503_v20, %v860_v6  ;;  %vm264_vm0 = vweird.f32 %v503_v20 }
  0xbe   :  { %389 = vst.msk [vmem:[%s972_s2 + $0x48] sm:$0xff] %vm379_vm1, %v372_v51  ;;  %v232_v45 = vmul.f32 %v501_v4, %v231_v44  ;;  %v377_v8 = vmul.f32 14.285714, %v361_v15  ;;  %v360_v13 = vmul.f32 %v344_v29, %v246_v54  ;;  %v296_v49 = vmul.f32 %v280_v2, %v630_v25  ;;  %vm265_vm3 = vmor %vm263_vm2, %vm264_vm0 }
  0xbf   :  { %v259_v53 = vmul.f32 %v503_v20, %v258_v58  ;;  %v281_v25 = vmul.f32 3.7796447, %v256_v19 }
  0xc0   :  { %v236_v33 = vsel %vm235_vm15, %v501_v4, %v232_v45  ;;  %394 = vst.msk [vmem:[%s972_s2 + $0x70] sm:$0xff] %vm379_vm1, %v377_v8  ;;  %v376_v60 = vmul.f32 14.285714, %v360_v13 }
  0xc1   :  { %v279_v55 = vmul.f32 3.7796447, %v236_v33  ;;  %v343_v16 = vmul.f32 %v236_v33, %v765_v48  ;;  %v260_v56 = vmul.f32 0.5, %v259_v53  ;;  %v297_v6 = vmul.f32 %v281_v25, %v628_v24 }
  0xc2   :  { %393 = vst.msk [vmem:[%s972_s2 + $0x68] sm:$0xff] %vm379_vm1, %v376_v60 }
  0xc3   :  { %v295_v27 = vmul.f32 %v279_v55, %v632_v26  ;;  %v359_v63 = vmul.f32 %v343_v16, %v236_v33  ;;  %v261_v3 = vsub.f32 1.5, %v260_v56 }
  0xc5   :  { %v452_v0 = vpack.c.bf16 %v296_v49, %v295_v27  ;;  %v375_v61 = vmul.f32 14.285714, %v359_v63  ;;  %v262_v59 = vmul.f32 %v503_v20, %v261_v3 }
  0xc7   :  { %464 = vst [vmem:[#allocation5 + $0x30] sm:$0xff] %v452_v0   ;;  %v266_v48 = vsel %vm265_vm3, %v503_v20, %v262_v59 }
  0xc8   :  { %392 = vst.msk [vmem:[%s972_s2 + $0x60] sm:$0xff] %vm379_vm1, %v375_v61  ;;  %v282_v47 = vmul.f32 3.7796447, %v266_v48  ;;  %v346_v26 = vmul.f32 %v266_v48, %v841_v28 }
  0xca   :  { %v298_v57 = vmul.f32 %v282_v47, %v640_v30  ;;  %v362_v4 = vmul.f32 %v346_v26, %v266_v48 }
  0xcc   :  { %v457_v9 = vpack.c.bf16 %v298_v57, %v297_v6  ;;  %v378_v41 = vmul.f32 14.285714, %v362_v4 }
  0xce   :  { %465 = vst [vmem:[#allocation5 + $0x38] sm:$0xff] %v457_v9  }
  0xcf   :  { %395 = vst.msk [vmem:[%s972_s2 + $0x78] sm:$0xff] %vm379_vm1, %v378_v41 }
  0xd0   :  { %408 = dma.vmem_to_hbm [thread:$0]  %s401_s17, 1024, %s403_s20, [#allocation4], %s560_s23, %s560_s23, %s561_s24  }
  0xd1   :  { %554 = dma.done.wait [#allocation4], 1024  }
  0xd2   :  { %555 = vsyncadd [#allocation4], 4294966272 }
  0xd3   :  { %417 = vsyncpa [#allocation3], 1 }
  0xd4   :  { %418 = vsyncpa [#allocation4], 1 }

</bundles_post_ra>
